<compile_context>
chip_gen: v5e
topology: v5e:2x2
jax: 0.10.0
libtpu: 0.0.40
codegen_flags: <defaults>
</compile_context>

<pallas_src>
import functools

import numpy as np

import jax
import jax.numpy as jnp
from jax.experimental import pallas as pl
from jax.experimental.pallas import tpu as pltpu


# ----------------------------- Pallas kernel ------------------------------- #

def _dot_pool_kernel(x_ref, m_ref, o_ref, *, num_patch_elems, eps):
    """x_ref: (TILE_R, K) rows of x; m_ref: (K, L) 0/1 window matrix; o_ref: (TILE_R, L)."""
    v = x_ref[...].astype(jnp.float32)        # (TILE_R, K)
    m = m_ref[...]                            # (K, L), f32, entries in {0, 1}

    def window_sum(a):
        # Exact window sums on the MXU: split the operand into a bf16 "hi" part
        # and an f32 residual "lo".  Both partial products against the 0/1
        # matrix are exact in a single bf16 MXU pass (f32 accumulation), so the
        # result matches the f32 sum to ~1e-5 relative *regardless* of the
        # default f32 matmul precision.  FLOPs are negligible (HBM-bound op).
        hi = a.astype(jnp.bfloat16).astype(jnp.float32)
        lo = a - hi
        return (jnp.dot(hi, m, preferred_element_type=jnp.float32)
                + jnp.dot(lo, m, preferred_element_type=jnp.float32))

    s = window_sum(v)                         # sum over each pooling window
    sq = window_sum(v * v)                    # sum of squares over each window

    inv_p = 1.0 / num_patch_elems
    ref_norm = float(num_patch_elems) ** 0.5
    p_avg = s * inv_p                         # window mean
    p_norm = jnp.sqrt(sq) + eps               # ||patch||_2 + eps
    denom = p_norm * ref_norm + eps
    # cos_sim = P * p_avg / denom == s / denom;  exact divide (review item).
    cos_sim = s / denom
    o_ref[...] = (cos_sim * p_avg).astype(o_ref.dtype)


# ----------------------------- host-side glue ------------------------------ #

def _normalize_pool_args(kernel_size, stride):
    if isinstance(kernel_size, int):
        kernel_size = (kernel_size, kernel_size)
    kH, kW = kernel_size
    if stride is None:
        stride = (kH, kW)
    elif isinstance(stride, int):
        stride = (stride, stride)
    sH, sW = stride
    return kH, kW, sH, sW


def _window_matrix_rows(kH, kW, sW, W, out_w):
    """0/1 matrix (kH*W, out_w) summing a full kHxkW window per flattened x-row.

    Valid when stride_h == kernel_h and H % kH == 0, i.e. each output row's
    window lives inside one (kH*W)-wide row of x.reshape(B*C*out_h, kH*W).
    """
    m = np.zeros((kH * W, out_w), np.float32)
    for di in range(kH):
        for ow in range(out_w):
            start = di * W + ow * sW
            m[start:start + kW, ow] = 1.0
    return jnp.asarray(m)


def _window_matrix_flat(kH, kW, sH, sW, H, W, out_h, out_w):
    """General 0/1 matrix (H*W, out_h*out_w): unfold + window-sum + compaction."""
    m = np.zeros((H * W, out_h * out_w), np.float32)
    for oh in range(out_h):
        for ow in range(out_w):
            col = oh * out_w + ow
            for di in range(kH):
                start = (oh * sH + di) * W + ow * sW
                m[start:start + kW, col] = 1.0
    return jnp.asarray(m)


def _choose_row_tile(n_rows, in_cols, out_cols, in_itemsize,
                     target_steps=8, block_budget_bytes=8 << 20):
    """Rows per grid step: multiple of 8, ~8 MiB VMEM footprint, >=8 grid steps
    when possible (>=3-4 pipelined steps per v7x TensorCore)."""
    if n_rows <= 8:
        return max(int(n_rows), 1)

    def pad128(n):
        return ((n + 127) // 128) * 128

    # Double-buffered input + output blocks plus f32 temporaries (v, v*v, hi/lo,
    # s, sq) -- counted so raising the budget later will not VMEM-OOM.
    per_row = (2 * pad128(in_cols) * in_itemsize
               + 2 * pad128(out_cols) * 4
               + 4 * pad128(in_cols) * 4
               + 4 * pad128(out_cols) * 4)
    cap = max(8, int(block_budget_bytes // per_row))
    if n_rows >= 8 * target_steps:
        cap = min(cap, n_rows // target_steps)
    cap = max(8, (cap // 8) * 8)
    return int(min(cap, n_rows))


def _pooled_call(x2d, m, num_patch_elems, eps):
    """Shared pallas_call for both layouts.  x2d: (R, K); m: (K, L) -> (R, L)."""
    R, K = x2d.shape
    K2, L = m.shape
    assert K2 == K

    tile_r = _choose_row_tile(R, K, L, x2d.dtype.itemsize)
    grid = (pl.cdiv(R, tile_r),)

    kernel = functools.partial(
        _dot_pool_kernel, num_patch_elems=num_patch_elems, eps=eps)

    flops = int(8 * R * K * L + 6 * R * K + 8 * R * L)       # 4 small MXU dots + VPU epilogue
    bytes_accessed = int(R * K * x2d.dtype.itemsize + K * L * 4
                         + R * L * x2d.dtype.itemsize)

    return pl.pallas_call(
        kernel,
        out_shape=jax.ShapeDtypeStruct((R, L), x2d.dtype),
        grid_spec=pltpu.PrefetchScalarGridSpec(
            num_scalar_prefetch=0,
            grid=grid,
            in_specs=[
                # Row slab of x: contiguous in HBM (tile_r * K * itemsize bytes).
                pl.BlockSpec((tile_r, K), lambda i: (i, 0)),
                # Constant window matrix: constant index_map -> DMA'd once.
                pl.BlockSpec((K, L), lambda i: (0, 0)),
            ],
            out_specs=pl.BlockSpec((tile_r, L), lambda i: (i, 0)),
        ),
        compiler_params=pltpu.CompilerParams(
            dimension_semantics=("parallel",),
            # Explicit scoped-VMEM limit: above v5e's 16 MiB default, well under
            # v7x's 64 MiB per-core physical; actual block footprint is <=~8 MiB.
            vmem_limit_bytes=40 << 20,
        ),
        cost_estimate=pl.CostEstimate(
            flops=flops, transcendentals=int(R * L), bytes_accessed=bytes_accessed),
    )(x2d, m)


def dot_pooling(x, kernel_size, stride=None, eps=1e-6):
    """Forward pass of DotPooling. x: (B, C, H, W), f32 or bf16 (NCHW)."""
    kH, kW, sH, sW = _normalize_pool_args(kernel_size, stride)
    B, C, H, W = x.shape
    out_h = (H - kH) // sH + 1
    out_w = (W - kW) // sW + 1
    P = kH * kW

    if sH == kH and H % kH == 0:
        # DotPoolCNN case (non-overlapping in H): x -> (B*C*out_h, kH*W) is a
        # free, contiguous reshape; the kernel reads x exactly once from HBM.
        x2 = x.reshape(B * C * out_h, kH * W)
        m = _window_matrix_rows(kH, kW, sW, W, out_w)
        out2 = _pooled_call(x2, m, P, eps)                   # (B*C*out_h, out_w)
    else:
        # General / overlapping fallback: whole images in the lane axis; the
        # selection matrix does the full 2-D unfold + sum + compaction.
        x2 = x.reshape(B * C, H * W)
        m = _window_matrix_flat(kH, kW, sH, sW, H, W, out_h, out_w)
        out2 = _pooled_call(x2, m, P, eps)                   # (B*C, out_h*out_w)

    return out2.reshape(B, C, out_h, out_w)                  # free reshape


# ------------------------------- reference --------------------------------- #

def _reference(x, kernel_size, stride=None, eps=1e-6):
    """Pure-JAX reference mirroring the PyTorch DotPooling module."""
    kH, kW, sH, sW = _normalize_pool_args(kernel_size, stride)
    B, C, H, W = x.shape
    out_h = (H - kH) // sH + 1
    out_w = (W - kW) // sW + 1
    slabs = []
    for di in range(kH):
        for dj in range(kW):
            slabs.append(x[:, :,
                           di:di + (out_h - 1) * sH + 1:sH,
                           dj:dj + (out_w - 1) * sW + 1:sW])
    patches = jnp.stack(slabs, axis=0).astype(jnp.float32)   # (P, B, C, oh, ow)
    p_avg = patches.mean(axis=0)
    p_norm = jnp.sqrt(jnp.sum(patches ** 2, axis=0)) + eps
    ref_norm = (kH * kW) ** 0.5
    cos_sim = kH * kW * p_avg / (p_norm * ref_norm + eps)
    return (cos_sim * p_avg).astype(x.dtype)


# --------------------------------- test ------------------------------------ #

if __name__ == "__main__":
    key = jax.random.PRNGKey(0)
    keys = jax.random.split(key, 4)

    cases = [
        # (shape, kernel_size, stride)
        ((2, 4, 16, 16), 2, None),         # smoke; stride defaults to kernel (row path)
        ((4, 32, 32, 32), 2, 2),           # DotPoolCNN.pool1-like; 8-step grid
        ((2, 4, 16, 16), 3, 1),            # fully overlapping windows (flat path)
        ((2, 4, 16, 16), (2, 2), (2, 1)),  # overlapping in W only (row path, sW != kW)
    ]

    for kk, (shape, ks, st) in zip(keys, cases):
        x = jax.random.normal(kk, shape, dtype=jnp.float32)
        out = jax.block_until_ready(dot_pooling(x, kernel_size=ks, stride=st))
        ref = _reference(x, kernel_size=ks, stride=st)
        assert out.shape == ref.shape, (out.shape, ref.shape)
        max_err = float(jnp.max(jnp.abs(out - ref)))
        # Exact divide + hi/lo-split MXU sums: residual error is ~1e-5..1e-4
        # (f32 rounding of the bf16 residual), far tighter than the previous
        # approx-reciprocal tolerance.
        assert jnp.allclose(out, ref, atol=5e-4, rtol=5e-4), (
            f"mismatch vs reference for shape={shape}, k={ks}, s={st}, "
            f"max abs err={max_err}")

    print("KERNEL_OK")
</pallas_src>

<mosaic_0001>
module attributes {stable_mosaic.version = 11 : i64} {
  func.func @_dot_pool_kernel(%arg0: i32, %arg1: memref<8x32xf32, #tpu.memory_space<vmem>>, %arg2: memref<32x8xf32, #tpu.memory_space<vmem>>, %arg3: memref<8x8xf32, #tpu.memory_space<vmem>>) attributes {dimension_semantics = [#tpu.dimension_semantics<parallel>], iteration_bounds = array<i64: 8>, scalar_prefetch = 0 : i64, scratch_operands = 0 : i64, tpu.core_type = #tpu.core_type<tc>, window_params = [{transform_indices = @transform_0, window_bounds = array<i64: 8, 32>}, {pipeline_mode = #tpu.pipeline_mode<synchronous>, transform_indices = @transform_1, window_bounds = array<i64: 32, 8>}, {transform_indices = @transform_2, window_bounds = array<i64: 8, 8>}]} {
    %c0 = arith.constant 0 : index
    %c0_0 = arith.constant 0 : index
    %0 = vector.load %arg1[%c0, %c0_0] : memref<8x32xf32, #tpu.memory_space<vmem>>, vector<8x32xf32>
    %c0_1 = arith.constant 0 : index
    %c0_2 = arith.constant 0 : index
    %1 = vector.load %arg2[%c0_1, %c0_2] : memref<32x8xf32, #tpu.memory_space<vmem>>, vector<32x8xf32>
    %2 = arith.truncf %0 : vector<8x32xf32> to vector<8x32xbf16>
    %3 = arith.extf %2 : vector<8x32xbf16> to vector<8x32xf32>
    %4 = arith.subf %0, %3 : vector<8x32xf32>
    %cst = arith.constant dense<0.000000e+00> : vector<8x8xf32>
    %5 = tpu.matmul %3, %1, %cst {dimension_numbers = #tpu.dot_dimension_numbers<[1], [0], [0], [1], [0, 0, 1, 1], [], []>} : vector<8x32xf32>, vector<32x8xf32>, vector<8x8xf32> -> vector<8x8xf32>
    %cst_3 = arith.constant dense<0.000000e+00> : vector<8x8xf32>
    %6 = tpu.matmul %4, %1, %cst_3 {dimension_numbers = #tpu.dot_dimension_numbers<[1], [0], [0], [1], [0, 0, 1, 1], [], []>} : vector<8x32xf32>, vector<32x8xf32>, vector<8x8xf32> -> vector<8x8xf32>
    %7 = arith.addf %5, %6 : vector<8x8xf32>
    %8 = arith.mulf %0, %0 : vector<8x32xf32>
    %9 = arith.truncf %8 : vector<8x32xf32> to vector<8x32xbf16>
    %10 = arith.extf %9 : vector<8x32xbf16> to vector<8x32xf32>
    %11 = arith.subf %8, %10 : vector<8x32xf32>
    %cst_4 = arith.constant dense<0.000000e+00> : vector<8x8xf32>
    %12 = tpu.matmul %10, %1, %cst_4 {dimension_numbers = #tpu.dot_dimension_numbers<[1], [0], [0], [1], [0, 0, 1, 1], [], []>} : vector<8x32xf32>, vector<32x8xf32>, vector<8x8xf32> -> vector<8x8xf32>
    %cst_5 = arith.constant dense<0.000000e+00> : vector<8x8xf32>
    %13 = tpu.matmul %11, %1, %cst_5 {dimension_numbers = #tpu.dot_dimension_numbers<[1], [0], [0], [1], [0, 0, 1, 1], [], []>} : vector<8x32xf32>, vector<32x8xf32>, vector<8x8xf32> -> vector<8x8xf32>
    %14 = arith.addf %12, %13 : vector<8x8xf32>
    %cst_6 = arith.constant 2.500000e-01 : f32
    %15 = vector.broadcast %cst_6 : f32 to vector<8x8xf32>
    %16 = arith.mulf %7, %15 : vector<8x8xf32>
    %17 = math.sqrt %14 : vector<8x8xf32>
    %cst_7 = arith.constant 9.99999997E-7 : f32
    %18 = vector.broadcast %cst_7 : f32 to vector<8x8xf32>
    %19 = arith.addf %17, %18 : vector<8x8xf32>
    %cst_8 = arith.constant 2.000000e+00 : f32
    %20 = vector.broadcast %cst_8 : f32 to vector<8x8xf32>
    %21 = arith.mulf %19, %20 : vector<8x8xf32>
    %cst_9 = arith.constant 9.99999997E-7 : f32
    %22 = vector.broadcast %cst_9 : f32 to vector<8x8xf32>
    %23 = arith.addf %21, %22 : vector<8x8xf32>
    %24 = arith.divf %7, %23 : vector<8x8xf32>
    %25 = arith.mulf %24, %16 : vector<8x8xf32>
    %c0_10 = arith.constant 0 : index
    %c0_11 = arith.constant 0 : index
    %26 = vector.load %arg3[%c0_10, %c0_11] : memref<8x8xf32, #tpu.memory_space<vmem>>, vector<8x8xf32>
    tpu.vector_store %arg3[%c0_10, %c0_11], %25 {strides = array<i32>} : memref<8x8xf32, #tpu.memory_space<vmem>>, vector<8x8xf32>,
    return
  }
  func.func @transform_0(%arg0: i32) -> (i32, i32) {
    %c0_i32 = arith.constant 0 : i32
    %c0_i32_0 = arith.constant 0 : i32
    return %arg0, %c0_i32 : i32, i32
  }
  func.func @transform_1(%arg0: i32) -> (i32, i32) {
    %c0_i32 = arith.constant 0 : i32
    %c0_i32_0 = arith.constant 0 : i32
    %c0_i32_1 = arith.constant 0 : i32
    return %c0_i32, %c0_i32_0 : i32, i32
  }
  func.func @transform_2(%arg0: i32) -> (i32, i32) {
    %c0_i32 = arith.constant 0 : i32
    %c0_i32_0 = arith.constant 0 : i32
    return %arg0, %c0_i32 : i32, i32
  }
}

</mosaic_0001>

<bundles_post_ra>
// kernel: tpu_custom_call.1
= control target key start
LH: loop header
LB: loop body
LE: loop exit
PB: predicated region body
PF: predicated region fallthrough
CT: control target
= control target key end

     0   :  { %s379_s9 = smov 0   ;;  %s415_s0 = inlined_call_operand.vmem [shape: f32[64,32], index: 0, kind: input, shape index: {}]   ;;  %s416_s1 = inlined_call_operand.vmem [shape: f32[32,8], index: 1, kind: input, shape index: {}]   ;;  %s417_s2 = inlined_call_operand.vmem [shape: f32[64,8], index: 2, kind: output, shape index: {}]  }
   0x1 LB: > { %s331_s10 = sadd.s32 4294967295, %s362_s9   ;;  %p335_p0 = scmp.ge.s32.totalorder %s362_s9, 1  ;;  %s362_s9 = sphi %s379_s9, %s12_s9  }
   0x2   : > { %p111_p1 = scmp.lt.s32.totalorder %s362_s9, 9 }
   0x4   : > { %p112_p2 = pnand %p335_p0, %p111_p1 }
   0x5   : > { %p131_p3 = scmp.lt.s32.totalorder (!%p112_p2), %s331_s10, 7 }
   0x6   : > { %115 = sbr.rel (%p112_p2) target bundleno = 206 (0xce), region = 28 }
   0xb   : > { %v143_v0 = vld [vmem:[%s416_s1 + $0x18] sm:$0xff]  ;;  %v142_v1 = vld [vmem:[%s416_s1 + $0x10] sm:$0xff]  ;;  %v141_v2 = vld [vmem:[%s416_s1 + $0x8] sm:$0xff]  ;;  %s419_s10 = smov (!%p131_p3, %s331_s10), 7  ;;  %vm147_vm0 = vcmask 261120   ;;  %vm276_vm7 = vcmask 64512  }
   0xc   : > { %213 = vmatpush.msra.mxu2 %v143_v0  ;;  %236 = vmatpush.msra.mxu3 %v143_v0  ;;  %v140_v3 = vld [vmem:[%s416_s1] sm:$0xff]  ;;  %s336_s19 = sshll.u32 %s419_s10, 3 }
   0xd   : > { %163 = vmatpush.msra.mxu0 %v143_v0  ;;  %186 = vmatpush.msra.mxu1 %v143_v0  ;;  %s134_s22 = scalar_lea.vmem %s415_s0, %s336_s19  ;;  %s138_s25 = scalar_lea.vmem %s417_s2, %s336_s19 }
   0xe   : > { %214 = vmatpush.msra.mxu2 %v142_v1  ;;  %237 = vmatpush.msra.mxu3 %v142_v1  ;;  %v139_v4 = vld [vmem:[%s134_s22] sm:$0xff] }
   0xf   : > { %164 = vmatpush.msra.mxu0 %v142_v1  ;;  %187 = vmatpush.msra.mxu1 %v142_v1  ;;  %v194_v5 = vmul.f32 %v139_v4, %v139_v4  ;;  %v144_v6 = vpack.c.bf16 %v139_v4, %v139_v4 }
  0x10   : > { %215 = vmatpush.msra.mxu2 %v141_v2  ;;  %238 = vmatpush.msra.mxu3 %v141_v2 }
  0x11   : > { %165 = vmatpush.msra.mxu0 %v141_v2  ;;  %188 = vmatpush.msra.mxu1 %v141_v2  ;;  %v195_v7 = vpack.c.bf16 %v194_v5, %v194_v5  ;;  %v145_v8 = vunpack.c.l.bf16 %v144_v6 }
  0x12   : > { %216 = vmatpush.msra.mxu2 %v140_v3  ;;  %239 = vmatpush.msra.mxu3 %v140_v3 }
  0x13   : > { %166 = vmatpush.msra.mxu0 %v140_v3  ;;  %189 = vmatpush.msra.mxu1 %v140_v3  ;;  %v196_v9 = vunpack.c.l.bf16 %v195_v7  ;;  %v146_v10 = vsub.f32 %v139_v4, %v145_v8 }
  0x14   : > { %339 = vmatmul.msk.f32.vlgmr.msra.gmra.mxu1 %vm147_vm0, %v145_v8 }
  0x15   : > { %v197_v11 = vsub.f32 %v194_v5, %v196_v9  ;;  %341 = vmatmul.msk.f32.vlgmr.msra.gmra.mxu3 %vm147_vm0, %v196_v9  ;;  %338 = vmatmul.msk.f32.vlgmr.msra.gmra.mxu0 %vm147_vm0, %v146_v10 }
  0x17   : > { %340 = vmatmul.msk.f32.vlgmr.msra.gmra.mxu2 %vm147_vm0, %v197_v11 }
  0x91   : > { %v191_v31 = vpop.f32.mrf.mxu1 }
  0x92   : > { %v168_v30 = vpop.f32.mrf.mxu0 }
  0x93   : > { %v192_v34 = vadd.f32 %v191_v31, %v168_v30 }
  0x95   : > { %v244_v39 = vmul.f32 0.25, %v192_v34 }
  0x98   : > { %v241_v12 = vpop.f32.mrf.mxu3 }
  0x9a   : > { %v218_v13 = vpop.f32.mrf.mxu2 }
  0x9b   : > { %v242_v14 = vadd.f32 %v241_v12, %v218_v13 }
  0x9d   : > { %352 = vrsqrt.f32 %v242_v14  ;;  %vm252_vm1 = vcmp.eq.f32.partialorder %v242_v14, inf  ;;  %v255_v22 = vand.u32 2147483648, %v242_v14  ;;  %vm254_vm2 = vcmp.eq.f32.partialorder %v242_v14, 0.0 }
  0xa3   : > { %v353_v15 = vpop.eup %352 }
  0xa4   : > { %v246_v16 = vmul.f32 %v353_v15, %v242_v14 }
  0xa6   : > { %v247_v17 = vmul.f32 %v353_v15, %v246_v16 }
  0xa8   : > { %v248_v18 = vmul.f32 0.5, %v247_v17 }
  0xaa   : > { %v249_v19 = vsub.f32 1.5, %v248_v18 }
  0xac   : > { %v250_v20 = vmul.f32 %v353_v15, %v249_v19 }
  0xae   : > { %v251_v21 = vmul.f32 %v250_v20, %v242_v14 }
  0xb0   : > { %v253_v23 = vsel %vm252_vm1, %v242_v14, %v251_v21 }
  0xb1   : > { %v256_v24 = vsel %vm254_vm2, %v255_v22, %v253_v23 }
  0xb2   : > { %v257_v25 = vadd.f32 1e-06, %v256_v24 }
  0xb4   : > { %v258_v26 = vmul.f32 2.0, %v257_v25 }
  0xb6   : > { %v259_v27 = vadd.f32 1e-06, %v258_v26 }
  0xb8   : > { %354 = vrcp.f32 %v259_v27  ;;  %v271_v33 = vand.u32 2147483648, %v259_v27  ;;  %v269_v36 = vand.u32 2147483647, %v259_v27  ;;  %vm265_vm4 = vweird.f32 %v259_v27 }
  0xba   : > { %v272_v38 = vor.u32 1.1754944e-38, %v271_v33  ;;  %vm270_vm6 = vcmp.eq.f32.partialorder %v269_v36, 8.507059e+37 }
  0xbe   : > { %v355_v28 = vpop.eup %354 }
  0xbf   : > { %v261_v29 = vmul.f32 %v355_v28, %v259_v27  ;;  %vm266_vm3 = vweird.f32 %v355_v28 }
  0xc0   : > { %vm267_vm5 = vmor %vm265_vm4, %vm266_vm3 }
  0xc1   : > { %v262_v32 = vsub.f32 1.0, %v261_v29 }
  0xc3   : > { %v263_v35 = vmul.f32 %v355_v28, %v262_v32 }
  0xc5   : > { %v264_v37 = vadd.f32 %v355_v28, %v263_v35 }
  0xc7   : > { %v268_v40 = vsel %vm267_vm5, %v355_v28, %v264_v37 }
  0xc8   : > { %v273_v41 = vsel %vm270_vm6, %v272_v38, %v268_v40 }
  0xc9   : > { %v274_v42 = vmul.f32 %v273_v41, %v192_v34 }
  0xcb   : > { %v275_v43 = vmul.f32 %v274_v42, %v244_v39 }
  0xcd   : > { %277 = vst.msk [vmem:[%s138_s25] sm:$0xff] %vm276_vm7, %v275_v43 }
  0xce PF: > { %s12_s9 = sadd.s32 1, %s362_s9  }
  0xcf   : > { %p9_p4 = scmp.ge.s32.totalorder %s12_s9, 10  }
  0xd1   :  { %11 = sbr.rel (!%p9_p4) target bundleno = 1 (0x1), region = 58 }

</bundles_post_ra>
